<compile_context>
chip_gen: v7x
topology: tpu7x:2x2x1
jax: 0.10.0
libtpu: 0.0.40
codegen_flags: <defaults>
</compile_context>

<pallas_src>
from functools import partial

import jax
import jax.numpy as jnp
from jax.experimental import pallas as pl
from jax.experimental.pallas import tpu as pltpu

_LN_EPS = 1e-5  # nn.LayerNorm default


# --------------------------------------------------------------------------- #
# Helpers
# --------------------------------------------------------------------------- #
def _round_up(a, b):
    return ((a + b - 1) // b) * b


def _pick_tile(m, tm):
    tm_eff = max(8, min(tm, _round_up(m, 8)))
    return _round_up(tm_eff, 8)


def _vmem_cap_bytes():
    """~80% of the physical per-core VMEM (generation-aware: 64 MiB v7x, 128 MiB v5e/v6e)."""
    try:
        cap = int(pltpu.get_tpu_info().vmem_capacity_bytes)
    except Exception:
        cap = 64 << 20  # conservative default (v7x size)
    return max(32 << 20, int(0.8 * cap))


def _clamp_vmem(est):
    return int(min(max(est, 32 << 20), _vmem_cap_bytes()))


def _vmem_limit_bytes(tm, d, h, act_bytes, w_bytes, resident_bufs):
    io = 3 * 2 * tm * d * act_bytes               # x / attn / out row tiles, double buffered
    wts = resident_bufs * (d * h + h * d) * w_bytes
    vecs = resident_bufs * 8 * (5 * d + h) * 4    # (1, *) rows, sublane-padded
    tmp = tm * (h + 3 * d) * 4                    # f32 intermediates (xr, xn, h, y)
    return _clamp_vmem(io + wts + vecs + tmp + (4 << 20))


# --------------------------------------------------------------------------- #
# Kernels
# --------------------------------------------------------------------------- #
def _ln_kernel(x_ref, g_ref, b_ref, o_ref):
    # x_ref: (tm, D) row tile; g/b: (1, D) resident LayerNorm affine params.
    x = x_ref[...].astype(jnp.float32)
    mu = jnp.mean(x, axis=-1, keepdims=True)
    xc = x - mu
    var = jnp.mean(xc * xc, axis=-1, keepdims=True)
    y = xc * jax.lax.rsqrt(var + _LN_EPS)
    y = y * g_ref[...].astype(jnp.float32) + b_ref[...].astype(jnp.float32)
    o_ref[...] = y.astype(o_ref.dtype)


def _fused_block_kernel(x_ref, a_ref, g_ref, b_ref, w1_ref, b1_ref, w2_ref, b2_ref,
                        *rest, approximate, has_scale):
    """out = xr + [g2*] fc2(GELU(fc1(LN2(xr))));  xr = x + [g1*] attn_out."""
    if has_scale:
        s1_ref, s2_ref, o_ref = rest
    else:
        (o_ref,) = rest
        s1_ref = s2_ref = None

    def residual():
        x = x_ref[...].astype(jnp.float32)
        a = a_ref[...].astype(jnp.float32)
        if has_scale:
            a = a * s1_ref[...].astype(jnp.float32)
        return x + a

    xr = residual()                                   # (tm, D) f32
    mu = jnp.mean(xr, axis=-1, keepdims=True)
    xc = xr - mu
    var = jnp.mean(xc * xc, axis=-1, keepdims=True)
    xn = xc * jax.lax.rsqrt(var + _LN_EPS)
    xn = xn * g_ref[...].astype(jnp.float32) + b_ref[...].astype(jnp.float32)

    # fc1: operands in W1's dtype (bf16 feeds the MXU directly), f32 accumulation.
    hh = jnp.dot(xn.astype(w1_ref.dtype), w1_ref[...],
                 preferred_element_type=jnp.float32)
    hh = hh + b1_ref[...].astype(jnp.float32)
    hh = jax.nn.gelu(hh, approximate=approximate)     # nn.GELU default: exact erf
    # TODO(synk): on v6e/v7x the bias-add + GELU above could run in bf16 to halve VALU
    # passes; kept in f32 here for exactness and portable Mosaic lowering.

    # fc2: fold the downcast of the hidden activation into the matmul operand.
    y = jnp.dot(hh.astype(w2_ref.dtype), w2_ref[...],
                preferred_element_type=jnp.float32)
    y = y + b2_ref[...].astype(jnp.float32)
    if has_scale:
        y = y * s2_ref[...].astype(jnp.float32)

    # Re-derive the residual from the refs instead of keeping the (tm, D) f32 value
    # live across both matmuls (shorter live range, less scratch / vreg pressure).
    o_ref[...] = (residual() + y).astype(o_ref.dtype)


# --------------------------------------------------------------------------- #
# Wrappers
# --------------------------------------------------------------------------- #
def layernorm_pallas(x, gamma, beta, *, tm=1024):
    """LayerNorm over the last dim (norm1 of Block). HBM-bound -> big row tile."""
    orig_shape = x.shape
    d = orig_shape[-1]
    x2d = x.reshape(-1, d)
    m = x2d.shape[0]
    tm_eff = _pick_tile(m, tm)
    g2 = gamma.reshape(1, d)
    b2 = beta.reshape(1, d)

    out = pl.pallas_call(
        _ln_kernel,
        out_shape=jax.ShapeDtypeStruct((m, d), x.dtype),
        grid_spec=pltpu.PrefetchScalarGridSpec(
            num_scalar_prefetch=0,
            grid=(pl.cdiv(m, tm_eff),),
            in_specs=[
                pl.BlockSpec((tm_eff, d), lambda i: (i, 0)),   # x row tile
                pl.BlockSpec((1, d), lambda i: (0, 0)),        # gamma (resident)
                pl.BlockSpec((1, d), lambda i: (0, 0)),        # beta  (resident)
            ],
            out_specs=pl.BlockSpec((tm_eff, d), lambda i: (i, 0)),
        ),
        compiler_params=pltpu.CompilerParams(
            dimension_semantics=("parallel",),
            vmem_limit_bytes=_clamp_vmem(5 * tm_eff * d * 4 + (4 << 20)),
        ),
        cost_estimate=pl.CostEstimate(
            flops=int(10 * m * d),
            transcendentals=int(m),
            bytes_accessed=int(2 * m * d * x.dtype.itemsize),
        ),
    )(x2d, g2, b2)
    return out.reshape(orig_shape)


def fused_residual_mlp_pallas(x, attn_out, ln_g, ln_b, w1, b1, w2, b2,
                              gamma1=None, gamma2=None, *, tm=512,
                              approximate_gelu=False, mxu_dtype=jnp.bfloat16):
    """out = xr + [g2*] fc2(GELU(fc1(LN(xr)))),  xr = x + [g1*] attn_out  (fused Block tail)."""
    orig_shape = x.shape
    d = orig_shape[-1]
    h = w1.shape[1]
    assert w1.shape[0] == d and w2.shape == (h, d), "weights must be (D,H) / (H,D)"
    assert attn_out.shape == orig_shape

    # MXU-friendly operand dtype: downcast f32 weights (accumulation stays f32 via
    # preferred_element_type in-kernel). Never upcast already-narrow weights.
    if (mxu_dtype is not None
            and jnp.dtype(w1.dtype).itemsize > jnp.dtype(mxu_dtype).itemsize):
        w1 = w1.astype(mxu_dtype)
        w2 = w2.astype(mxu_dtype)

    x2d = x.reshape(-1, d)
    a2d = attn_out.reshape(-1, d)
    m = x2d.shape[0]
    tm_eff = _pick_tile(m, tm)

    g2 = ln_g.reshape(1, d)
    bb = ln_b.reshape(1, d)
    b1r = b1.reshape(1, h)
    b2r = b2.reshape(1, d)

    has_scale = (gamma1 is not None) or (gamma2 is not None)
    extra = []
    if has_scale:  # 'per_channel' (1,1,D) or 'scalar' (1,1,1) -> broadcast to (1, D)
        s1 = jnp.broadcast_to(jnp.asarray(1.0 if gamma1 is None else gamma1,
                                          jnp.float32).reshape(1, -1), (1, d))
        s2 = jnp.broadcast_to(jnp.asarray(1.0 if gamma2 is None else gamma2,
                                          jnp.float32).reshape(1, -1), (1, d))
        extra = [s1, s2]

    kernel = partial(_fused_block_kernel, approximate=approximate_gelu,
                     has_scale=has_scale)

    def build(single_buffer):
        def res_spec(shape):
            # Resident operands: constant index_map -> one fetch; request 1 buffer
            # instead of the default 2 (halves resident-weight VMEM).
            if single_buffer:
                return pl.BlockSpec(shape, lambda i: (0, 0),
                                    pipeline_mode=pl.Buffered(1))
            return pl.BlockSpec(shape, lambda i: (0, 0))

        row_spec = pl.BlockSpec((tm_eff, d), lambda i: (i, 0))
        in_specs = [row_spec, row_spec,                   # x, attn_out row tiles
                    res_spec((1, d)), res_spec((1, d)),   # LN gamma / beta
                    res_spec((d, h)), res_spec((1, h)),   # W1, b1
                    res_spec((h, d)), res_spec((1, d))]   # W2, b2
        if has_scale:
            in_specs += [res_spec((1, d)), res_spec((1, d))]   # gamma1, gamma2

        resident_bufs = 1 if single_buffer else 2
        cost = pl.CostEstimate(
            flops=int(2 * m * (d * h + h * d) + 20 * m * d),
            transcendentals=int(m * h + m),
            bytes_accessed=int(3 * m * d * x.dtype.itemsize
                               + 2 * d * h * w1.dtype.itemsize),
        )
        return pl.pallas_call(
            kernel,
            out_shape=jax.ShapeDtypeStruct((m, d), x.dtype),
            grid_spec=pltpu.PrefetchScalarGridSpec(
                num_scalar_prefetch=0,
                grid=(pl.cdiv(m, tm_eff),),
                in_specs=in_specs,
                out_specs=pl.BlockSpec((tm_eff, d), lambda i: (i, 0)),
            ),
            compiler_params=pltpu.CompilerParams(
                dimension_semantics=("parallel",),
                vmem_limit_bytes=_vmem_limit_bytes(
                    tm_eff, d, h, x.dtype.itemsize, w1.dtype.itemsize,
                    resident_bufs),
            ),
            cost_estimate=cost,
        )
    # TODO(synk): for very large MLPs (bf16 weights > ~40 MiB resident, e.g. ViT-g/H on
    # v7x) add a second "arbitrary" grid axis over H and accumulate fc2 panels into a
    # (tm, D) f32 scratch with pl.when init/finalize; not needed at ViT-B/L sizes.

    args = (x2d, a2d, g2, bb, w1, b1r, w2, b2r, *extra)
    try:
        out = build(single_buffer=True)(*args)
    except Exception:
        # Fallback for jax versions where single-buffer pipeline_mode is unsupported.
        out = build(single_buffer=False)(*args)
    return out.reshape(orig_shape)


def block_forward(x, params, attn_fn, *, layer_scale=False, tm=512,
                  approximate_gelu=False, mxu_dtype=jnp.bfloat16):
    """OmniMAE Block forward. Dropout / DropPath are identity (p = 0.0)."""
    # norm1 -> attention (external). TODO(synk): `attn_target` is an externally injected
    # module with no definition in this spec; `attn_fn` is supplied by the caller.
    a = attn_fn(layernorm_pallas(x, params["ln1_g"], params["ln1_b"]))
    # Fused: x + [g1*]a, norm2, fc1, GELU, fc2, [g2*], residual — one Pallas kernel.
    return fused_residual_mlp_pallas(
        x, a, params["ln2_g"], params["ln2_b"],
        params["w1"], params["b1"], params["w2"], params["b2"],
        gamma1=params["gamma1"] if layer_scale else None,
        gamma2=params["gamma2"] if layer_scale else None,
        tm=tm, approximate_gelu=approximate_gelu, mxu_dtype=mxu_dtype)


# --------------------------------------------------------------------------- #
# Pure-JAX references
# --------------------------------------------------------------------------- #
def _ln_ref(x, g, b):
    mu = jnp.mean(x, axis=-1, keepdims=True)
    xc = x - mu
    var = jnp.mean(xc * xc, axis=-1, keepdims=True)
    return xc * jax.lax.rsqrt(var + _LN_EPS) * g + b


def _mlp_ref(x, w1, b1, w2, b2, approximate):
    h = jax.nn.gelu(x @ w1 + b1, approximate=approximate)
    return h @ w2 + b2


def _block_ref(x, p, attn_fn, layer_scale, approximate):
    a = attn_fn(_ln_ref(x, p["ln1_g"], p["ln1_b"]))
    if layer_scale:
        a = a * p["gamma1"]
    x = x + a
    m = _mlp_ref(_ln_ref(x, p["ln2_g"], p["ln2_b"]),
                 p["w1"], p["b1"], p["w2"], p["b2"], approximate)
    if layer_scale:
        m = m * p["gamma2"]
    return x + m


def _make_demo_attn(key, dim):
    """Deterministic single-head self-attention stand-in for the injected attn_target."""
    kq, kk, kv, ko = jax.random.split(key, 4)
    wq = 0.05 * jax.random.normal(kq, (dim, dim), jnp.float32)
    wk = 0.05 * jax.random.normal(kk, (dim, dim), jnp.float32)
    wv = 0.05 * jax.random.normal(kv, (dim, dim), jnp.float32)
    wo = 0.05 * jax.random.normal(ko, (dim, dim), jnp.float32)
    inv_sqrt_d = 1.0 / float(dim) ** 0.5

    def attn(x):  # x: (B, S, D)
        q, k, v = x @ wq, x @ wk, x @ wv
        a = jax.nn.softmax(jnp.einsum("bqd,bkd->bqk", q, k) * inv_sqrt_d, axis=-1)
        return jnp.einsum("bqk,bkd->bqd", a, v) @ wo

    return attn


if __name__ == "__main__":
    batch, seq, dim = 2, 8, 128          # dim multiple of 128 -> lane-dense tiles
    hidden = int(dim * 4.0)              # mlp_ratio = 4.0

    key = jax.random.PRNGKey(0)
    ks = jax.random.split(key, 10)
    x = jax.random.normal(ks[0], (batch, seq, dim), jnp.float32)

    params = {
        "ln1_g": 1.0 + 0.02 * jax.random.normal(ks[1], (dim,), jnp.float32),
        "ln1_b": 0.02 * jax.random.normal(ks[2], (dim,), jnp.float32),
        "ln2_g": 1.0 + 0.02 * jax.random.normal(ks[3], (dim,), jnp.float32),
        "ln2_b": 0.02 * jax.random.normal(ks[4], (dim,), jnp.float32),
        "w1": 0.05 * jax.random.normal(ks[5], (dim, hidden), jnp.float32),
        "b1": 0.05 * jax.random.normal(ks[6], (hidden,), jnp.float32),
        "w2": 0.05 * jax.random.normal(ks[7], (hidden, dim), jnp.float32),
        "b2": 0.05 * jax.random.normal(ks[8], (dim,), jnp.float32),
        "gamma1": jnp.full((1, 1, dim), 1e-4, jnp.float32),   # per_channel layer scale
        "gamma2": jnp.full((1, 1, dim), 1e-4, jnp.float32),
    }
    attn_fn = _make_demo_attn(ks[9], dim)

    # 1) Exact path (f32 MXU operands), layer_scale_type = None — tight tolerance.
    y_exact = jax.block_until_ready(
        block_forward(x, params, attn_fn, layer_scale=False, mxu_dtype=None))
    y_ref0 = _block_ref(x, params, attn_fn, layer_scale=False, approximate=False)
    assert y_exact.shape == x.shape
    assert jnp.allclose(y_exact, y_ref0, atol=5e-3, rtol=5e-3), "exact f32 path mismatch"

    # 2) Default fast path (bf16 MXU operands, f32 accumulation), layer_scale_type = None.
    y_fast = jax.block_until_ready(block_forward(x, params, attn_fn, layer_scale=False))
    assert jnp.allclose(y_fast, y_ref0, atol=2e-2, rtol=2e-2), "bf16-MXU path mismatch"

    # 3) Default fast path with layer_scale_type = 'per_channel'.
    y_ls = jax.block_until_ready(block_forward(x, params, attn_fn, layer_scale=True))
    y_ref1 = _block_ref(x, params, attn_fn, layer_scale=True, approximate=False)
    assert jnp.allclose(y_ls, y_ref1, atol=2e-2, rtol=2e-2), "layer_scale mismatch"

    # 4) Fully-bf16 activation/weight path through the fused kernel (attn_out = 0).
    to_bf16 = lambda a: a.astype(jnp.bfloat16)
    xb = to_bf16(x)
    yb = fused_residual_mlp_pallas(
        xb, jnp.zeros_like(xb),
        to_bf16(params["ln2_g"]), to_bf16(params["ln2_b"]),
        to_bf16(params["w1"]), to_bf16(params["b1"]),
        to_bf16(params["w2"]), to_bf16(params["b2"]))
    yb = jax.block_until_ready(yb)
    yb_ref = x + _mlp_ref(_ln_ref(x, params["ln2_g"], params["ln2_b"]),
                          params["w1"], params["b1"], params["w2"], params["b2"],
                          approximate=False)
    assert jnp.allclose(yb.astype(jnp.float32), yb_ref, atol=1e-1, rtol=1e-1), \
        "bf16 path mismatch"

    print("KERNEL_OK")
</pallas_src>

<mosaic_0001>
module attributes {stable_mosaic.version = 11 : i64} {
  func.func @_ln_kernel(%arg0: i32, %arg1: memref<16x128xf32, #tpu.memory_space<vmem>>, %arg2: memref<1x128xf32, #tpu.memory_space<vmem>>, %arg3: memref<1x128xf32, #tpu.memory_space<vmem>>, %arg4: memref<16x128xf32, #tpu.memory_space<vmem>>) attributes {dimension_semantics = [#tpu.dimension_semantics<parallel>], iteration_bounds = array<i64: 1>, scalar_prefetch = 0 : i64, scratch_operands = 0 : i64, tpu.core_type = #tpu.core_type<tc>, window_params = [{transform_indices = @transform_0, window_bounds = array<i64: 16, 128>}, {pipeline_mode = #tpu.pipeline_mode<synchronous>, transform_indices = @transform_1, window_bounds = array<i64: 1, 128>}, {pipeline_mode = #tpu.pipeline_mode<synchronous>, transform_indices = @transform_2, window_bounds = array<i64: 1, 128>}, {transform_indices = @transform_3, window_bounds = array<i64: 16, 128>}]} {
    %c0 = arith.constant 0 : index
    %c0_0 = arith.constant 0 : index
    %0 = vector.load %arg1[%c0, %c0_0] : memref<16x128xf32, #tpu.memory_space<vmem>>, vector<16x128xf32>
    %cst = arith.constant dense<0.000000e+00> : vector<16xf32>
    %1 = vector.multi_reduction <add>, %0, %cst [1] : vector<16x128xf32> to vector<16xf32>
    %2 = vector.shape_cast %1 : vector<16xf32> to vector<16x1xf32>
    %cst_1 = arith.constant 1.280000e+02 : f32
    %3 = vector.broadcast %cst_1 : f32 to vector<16x1xf32>
    %4 = arith.divf %2, %3 : vector<16x1xf32>
    %5 = vector.broadcast %4 : vector<16x1xf32> to vector<16x128xf32>
    %6 = arith.subf %0, %5 : vector<16x128xf32>
    %7 = arith.mulf %6, %6 : vector<16x128xf32>
    %cst_2 = arith.constant dense<0.000000e+00> : vector<16xf32>
    %8 = vector.multi_reduction <add>, %7, %cst_2 [1] : vector<16x128xf32> to vector<16xf32>
    %9 = vector.shape_cast %8 : vector<16xf32> to vector<16x1xf32>
    %cst_3 = arith.constant 1.280000e+02 : f32
    %10 = vector.broadcast %cst_3 : f32 to vector<16x1xf32>
    %11 = arith.divf %9, %10 : vector<16x1xf32>
    %cst_4 = arith.constant 9.99999974E-6 : f32
    %12 = vector.broadcast %cst_4 : f32 to vector<16x1xf32>
    %13 = arith.addf %11, %12 : vector<16x1xf32>
    %14 = math.rsqrt %13 : vector<16x1xf32>
    %15 = vector.broadcast %14 : vector<16x1xf32> to vector<16x128xf32>
    %16 = arith.mulf %6, %15 : vector<16x128xf32>
    %c0_5 = arith.constant 0 : index
    %c0_6 = arith.constant 0 : index
    %17 = vector.load %arg2[%c0_5, %c0_6] : memref<1x128xf32, #tpu.memory_space<vmem>>, vector<1x128xf32>
    %18 = vector.broadcast %17 : vector<1x128xf32> to vector<16x128xf32>
    %19 = arith.mulf %16, %18 : vector<16x128xf32>
    %c0_7 = arith.constant 0 : index
    %c0_8 = arith.constant 0 : index
    %20 = vector.load %arg3[%c0_7, %c0_8] : memref<1x128xf32, #tpu.memory_space<vmem>>, vector<1x128xf32>
    %21 = vector.broadcast %20 : vector<1x128xf32> to vector<16x128xf32>
    %22 = arith.addf %19, %21 : vector<16x128xf32>
    %c0_9 = arith.constant 0 : index
    %c0_10 = arith.constant 0 : index
    %23 = vector.load %arg4[%c0_9, %c0_10] : memref<16x128xf32, #tpu.memory_space<vmem>>, vector<16x128xf32>
    tpu.vector_store %arg4[%c0_9, %c0_10], %22 {strides = array<i32>} : memref<16x128xf32, #tpu.memory_space<vmem>>, vector<16x128xf32>,
    return
  }
  func.func @transform_0(%arg0: i32) -> (i32, i32) {
    %c0_i32 = arith.constant 0 : i32
    %c0_i32_0 = arith.constant 0 : i32
    return %arg0, %c0_i32 : i32, i32
  }
  func.func @transform_1(%arg0: i32) -> (i32, i32) {
    %c0_i32 = arith.constant 0 : i32
    %c0_i32_0 = arith.constant 0 : i32
    %c0_i32_1 = arith.constant 0 : i32
    return %c0_i32, %c0_i32_0 : i32, i32
  }
  func.func @transform_2(%arg0: i32) -> (i32, i32) {
    %c0_i32 = arith.constant 0 : i32
    %c0_i32_0 = arith.constant 0 : i32
    %c0_i32_1 = arith.constant 0 : i32
    return %c0_i32, %c0_i32_0 : i32, i32
  }
  func.func @transform_3(%arg0: i32) -> (i32, i32) {
    %c0_i32 = arith.constant 0 : i32
    %c0_i32_0 = arith.constant 0 : i32
    return %arg0, %c0_i32 : i32, i32
  }
}

</mosaic_0001>

<bundles_post_ra>
// kernel: tpu_custom_call.1
= control target key start
LH: loop header
LB: loop body
LE: loop exit
PB: predicated region body
PF: predicated region fallthrough
CT: control target
= control target key end

     0   :  { %8 = vsyncpa [#allocation3], 0  ;;  %s209_s0 = inlined_call_operand.hbm [shape: f32[16,128], index: 0, kind: input, shape index: {}]   ;;  %s210_s1 = inlined_call_operand.vmem [shape: f32[1,128], index: 1, kind: input, shape index: {}]   ;;  %s211_s2 = inlined_call_operand.vmem [shape: f32[1,128], index: 2, kind: input, shape index: {}]   ;;  %s212_s3 = inlined_call_operand.hbm [shape: f32[16,128], index: 3, kind: output, shape index: {}]  }
   0x1   :  { %9 = vsyncpa [#allocation4], 0  ;;  %s149_s12 = smov [#allocation2]   ;;  %s101_s16 = scalar_lea.hbm %s209_s0, 256 }
   0x2   :  { %s15_s13 = sshll.u32 %s149_s12, 4  ;;  %p102_p0 = scmp.ne.s32.totalorder %s209_s0, %s101_s16  ;;  %s16_s13 = int_to_ptr.vmem [resolvable:$true] %s15_s13 }
   0x3   :  { %p105_p1 = scmp.lt.u32.totalorder %s101_s16, %s209_s0 }
   0x5   :  { %p107_p2 = pnand %p105_p1, %p102_p0 }
   0x7   :  { %110 = shalt.err (!%p107_p2)
}
   0x8   :  { %s111_s21 = scalar_lea.vmem %s16_s13, 256  ;;  %p116_p4 = scmp.lt.s32.totalorder %s16_s13, %s16_s13 }
   0x9   :  { %p112_p3 = scmp.ne.s32.totalorder %s16_s13, %s111_s21  ;;  %p117_p5 = scmp.lt.s32.totalorder %s111_s21, %s111_s21 }
   0xb   :  { %p118_p6 = por %p117_p5, %p116_p4 }
   0xd   :  { %p119_p7 = pnand %p118_p6, %p112_p3 }
   0xf   :  { %122 = shalt.err (!%p119_p7)
}
  0x10   :  { %s150_s22 = smov 128   ;;  %s151_s23 = smov 8  }
  0x11   :  { %21 = dma.hbm_to_vmem [thread:$0]  %s209_s0, 256, %s16_s13, [#allocation3], %s150_s22, %s150_s22, %s151_s23  }
  0x12   :  { %145 = dma.done.wait [#allocation3], 256  }
  0x13   :  { %146 = vsyncadd [#allocation3], 4294967040  ;;  %v29_v0 = vld [vmem:[#allocation2] sm:$0xff]  ;;  %v30_v1 = vld [vmem:[#allocation2 + $0x8] sm:$0xff]  ;;  %s152_s29 = smov [#allocation5]  }
  0x14   :  { %31 = vadd.xlane.f32.xlu0 %v29_v0  ;;  %v91_v17 = vld [vmem:[%s210_s1] ss:$0 sm:$0xff]  ;;  %s79_s30 = sshll.u32 %s152_s29, 4  ;;  %s80_s30 = int_to_ptr.vmem [resolvable:$true] %s79_s30 }
  0x15   :  { %v92_v19 = vld [vmem:[%s211_s2] ss:$0 sm:$0xff]  ;;  %s123_s4 = scalar_lea.vmem %s80_s30, 256  ;;  %p128_p9 = scmp.lt.s32.totalorder %s80_s30, %s80_s30 }
  0x16   :  { %p124_p8 = scmp.ne.s32.totalorder %s80_s30, %s123_s4  ;;  %p129_p10 = scmp.lt.s32.totalorder %s123_s4, %s123_s4 }
  0x18   :  { %33 = vadd.xlane.f32.xlu0 %v30_v1  ;;  %p130_p11 = por %p129_p10, %p128_p9 }
  0x1a   :  { %p131_p12 = pnand %p130_p11, %p124_p8 }
  0xa1   :  { %v32_v2 = vpop.xlane.xlu0 %31 }
  0xa2   :  { %v36_v3 = vmul.f32 0.0078125, %v32_v2 }
  0xa4   :  { %v38_v4 = vsub.f32 %v29_v0, %v36_v3 }
  0xa5   :  { %v34_v5 = vpop.xlane.xlu0 %33 }
  0xa6   :  { %v37_v6 = vmul.f32 0.0078125, %v34_v5  ;;  %v40_v7 = vmul.f32 %v38_v4, %v38_v4 }
  0xa8   :  { %v39_v8 = vsub.f32 %v30_v1, %v37_v6  ;;  %42 = vadd.xlane.f32.xlu1 %v40_v7 }
  0xaa   :  { %v41_v9 = vmul.f32 %v39_v8, %v39_v8 }
  0xac   :  { %44 = vadd.xlane.f32.xlu1 %v41_v9 }
 0x135   :  { %v43_v10 = vpop.xlane.xlu1 %42 }
 0x136   :  { %v46_v11 = vmul.f32 0.0078125, %v43_v10 }
 0x138   :  { %v48_v12 = vadd.f32 1e-05, %v46_v11 }
 0x139   :  { %v45_v13 = vpop.xlane.xlu1 %44 }
 0x13a   :  { %97 = vrsqrt.f32 %v48_v12  ;;  %v47_v14 = vmul.f32 0.0078125, %v45_v13 }
 0x13c   :  { %v49_v15 = vadd.f32 1e-05, %v47_v14 }
 0x13e   :  { %99 = vrsqrt.f32 %v49_v15 }
 0x144   :  { %v98_v16 = vpop.eup %97 }
 0x145   :  { %v52_v18 = vmul.f32 %v98_v16, %v38_v4 }
 0x147   :  { %v61_v20 = vmul.f32 %v91_v17, %v52_v18 }
 0x148   :  { %v100_v21 = vpop.eup %99 }
 0x149   :  { %v53_v22 = vmul.f32 %v100_v21, %v39_v8  ;;  %v70_v23 = vadd.f32 %v92_v19, %v61_v20 }
 0x14b   :  { %v62_v24 = vmul.f32 %v91_v17, %v53_v22  ;;  %72 = vst [vmem:[#allocation5] sm:$0xff] %v70_v23 }
 0x14d   :  { %v71_v25 = vadd.f32 %v92_v19, %v62_v24 }
 0x14f   :  { %73 = vst [vmem:[#allocation5 + $0x8] sm:$0xff] %v71_v25 }
 0x150   :  { %134 = shalt.err (!%p131_p12)
}
 0x151   :  { %s135_s5 = scalar_lea.hbm %s212_s3, 256 }
 0x152   :  { %p136_p13 = scmp.ne.s32.totalorder %s212_s3, %s135_s5  ;;  %p139_p0 = scmp.lt.u32.totalorder %s135_s5, %s212_s3 }
 0x154   :  { %p141_p1 = pnand %p139_p0, %p136_p13 }
 0x156   :  { %144 = shalt.err (!%p141_p1)
}
 0x157   :  { %85 = dma.vmem_to_hbm [thread:$0]  %s80_s30, 256, %s212_s3, [#allocation4], %s150_s22, %s150_s22, %s151_s23  }
 0x158   :  { %147 = dma.done.wait [#allocation4], 256  }
 0x159   :  { %148 = vsyncadd [#allocation4], 4294967040 }
 0x15a   :  { %89 = vsyncpa [#allocation3], 1 }
 0x15b   :  { %90 = vsyncpa [#allocation4], 1 }

</bundles_post_ra>
